<compile_context>
chip_gen: v6e
topology: v6e:2x2x1
jax: 0.10.0
libtpu: 0.0.40
codegen_flags: <defaults>
</compile_context>

<pallas_src>
import functools

import jax
import jax.numpy as jnp
from jax.experimental import pallas as pl
from jax.experimental.pallas import tpu as pltpu


def qkv_proj_kernel(q_ref, k_ref, v_ref, wq_ref, wk_ref, wv_ref,
                    qp_ref, kp_ref, vp_ref, *, n_head):
    """Project q/k/v once per token tile; head-major bf16 outputs."""
    bf16 = jnp.bfloat16
    f32 = jnp.float32
    xq = q_ref[0].astype(bf16)       # (tl, D)
    xk = k_ref[0].astype(bf16)
    xv = v_ref[0].astype(bf16)
    # Weights are already bf16 + head-major and 1/sqrt(d_k) is folded into wq,
    # so Q needs no in-kernel scaling.  Static head loop (n_head is small).
    for h in range(n_head):
        qp_ref[0, h] = jnp.dot(xq, wq_ref[h],
                               preferred_element_type=f32).astype(bf16)
        kp_ref[0, h] = jnp.dot(xk, wk_ref[h],
                               preferred_element_type=f32).astype(bf16)
        vp_ref[0, h] = jnp.dot(xv, wv_ref[h],
                               preferred_element_type=f32).astype(bf16)


def mha_attn_kernel(qres_ref, qp_ref, kp_ref, vp_ref, kbias_ref, qmask_ref,
                    wfc_ref, gamma_ref, beta_ref, o_ref, *, n_head):
    f32 = jnp.float32
    bf16 = jnp.bfloat16
    tq = qres_ref.shape[1]
    L = kp_ref.shape[2]
    D = qres_ref.shape[2]

    # Hoisted once: additive key-mask bias broadcast to (tq, L).  (JAX does not
    # CSE broadcast_in_dim, so doing this inside the head loop would emit
    # n_head separate broadcasts.)
    neg_bias = jnp.broadcast_to(kbias_ref[0], (tq, L))           # f32

    out = jnp.zeros((tq, D), dtype=f32)                          # lane-dense acc
    # TODO(synk): switch to lax.fori_loop over a head axis if n_head grows
    # large enough to create vreg/VMEM pressure (check bundle dumps).
    for h in range(n_head):
        qh = qp_ref[0, h]                                        # (tq, d_k) bf16
        kh = kp_ref[0, h]                                        # (L,  d_k) bf16
        vh = vp_ref[0, h]                                        # (L,  d_v) bf16

        # (q / temperature) @ k^T  (temperature folded into wq); contract d_k.
        scores = jax.lax.dot_general(qh, kh, (((1,), (1,)), ((), ())),
                                     preferred_element_type=f32)  # (tq, L)
        scores = scores + neg_bias                    # masked_fill(mask==0,-1e9)

        # numerically-stable softmax over keys (f32); denominator on the EUP.
        scores = scores - jnp.max(scores, axis=-1, keepdims=True)
        e = jnp.exp(scores)
        p = e * pl.reciprocal(jnp.sum(e, axis=-1, keepdims=True), approx=True)

        oh = jnp.dot(p.astype(bf16), vh, preferred_element_type=f32)  # (tq, d_v)
        # fc fused into the head loop: accumulate this head's fc contribution
        # into the (tq, D) accumulator (no concat scratch round-trip).
        out = out + jnp.dot(oh.astype(bf16), wfc_ref[h],
                            preferred_element_type=f32)

    # masked_fill(mask.unsqueeze(-1) == 0, 0): zeroing whole query rows commutes
    # with the bias-free fc, so apply once after the head accumulation.
    out = out * qmask_ref[0]                                     # (tq, 1) 0/1

    out = out + qres_ref[0]                                      # residual

    # LayerNorm over last dim (eps=1e-6, biased variance, like nn.LayerNorm).
    mean = jnp.mean(out, axis=-1, keepdims=True)
    var = jnp.mean((out - mean) ** 2, axis=-1, keepdims=True)
    normed = (out - mean) * jax.lax.rsqrt(var + 1e-6)
    o_ref[0] = normed * gamma_ref[...] + beta_ref[...]


def multi_head_attention(q, k, v, mask, wq, wk, wv, wfc, gamma, beta,
                         *, n_head, d_k, d_v, tq=128, tl=256):
    b, L, D = q.shape
    assert k.shape == v.shape and k.shape[0] == b and k.shape[2] == D
    assert k.shape[1] == L, "TODO(synk): len_q != len_k (cross-attn) not handled"
    f32, bf16 = jnp.float32, jnp.bfloat16

    tq = min(tq, L)
    tl = min(tl, L)
    assert L % tq == 0 and L % tl == 0, \
        "TODO(synk): ragged final block not handled"
    n_qb = L // tq
    n_lb = L // tl

    # ---- one-time host-side parameter prep (outside the hot path) ----
    inv_temp = 1.0 / (float(d_k) ** 0.5)
    wq_hm = (wq * inv_temp).reshape(D, n_head, d_k).transpose(1, 0, 2).astype(bf16)
    wk_hm = wk.reshape(D, n_head, d_k).transpose(1, 0, 2).astype(bf16)
    wv_hm = wv.reshape(D, n_head, d_v).transpose(1, 0, 2).astype(bf16)
    wfc_hm = wfc.reshape(n_head, d_v, D).astype(bf16)

    kbias = jnp.where(mask == 0, -1e9, 0.0).astype(f32)          # (b, 1, L)
    qmask = jnp.transpose(mask.astype(f32), (0, 2, 1))           # (b, L, 1)
    gamma2 = gamma.reshape(1, D).astype(f32)
    beta2 = beta.reshape(1, D).astype(f32)

    # NOTE: vmem_limit_bytes should be swept per generation (v5e/v6e: 64-96 MiB
    # is fine; v7x: stay well under the 64 MiB physical limit).
    cparams = pltpu.CompilerParams(
        dimension_semantics=("parallel", "parallel"),
        vmem_limit_bytes=48 * 1024 * 1024)

    # ---- kernel 1: Q/K/V projections, once per token, head-major bf16 ----
    Qp, Kp, Vp = pl.pallas_call(
        functools.partial(qkv_proj_kernel, n_head=n_head),
        out_shape=(jax.ShapeDtypeStruct((b, n_head, L, d_k), bf16),
                   jax.ShapeDtypeStruct((b, n_head, L, d_k), bf16),
                   jax.ShapeDtypeStruct((b, n_head, L, d_v), bf16)),
        grid=(b, n_lb),
        in_specs=[
            pl.BlockSpec((1, tl, D), lambda bi, li: (bi, li, 0)),         # q tile
            pl.BlockSpec((1, tl, D), lambda bi, li: (bi, li, 0)),         # k tile
            pl.BlockSpec((1, tl, D), lambda bi, li: (bi, li, 0)),         # v tile
            pl.BlockSpec((n_head, D, d_k), lambda bi, li: (0, 0, 0)),     # w_qs
            pl.BlockSpec((n_head, D, d_k), lambda bi, li: (0, 0, 0)),     # w_ks
            pl.BlockSpec((n_head, D, d_v), lambda bi, li: (0, 0, 0)),     # w_vs
        ],
        out_specs=(
            pl.BlockSpec((1, n_head, tl, d_k), lambda bi, li: (bi, 0, li, 0)),
            pl.BlockSpec((1, n_head, tl, d_k), lambda bi, li: (bi, 0, li, 0)),
            pl.BlockSpec((1, n_head, tl, d_v), lambda bi, li: (bi, 0, li, 0)),
        ),
        compiler_params=cparams,
    )(q, k, v, wq_hm, wk_hm, wv_hm)

    # ---- kernel 2: attention + fused fc + residual + LayerNorm ----
    return pl.pallas_call(
        functools.partial(mha_attn_kernel, n_head=n_head),
        out_shape=jax.ShapeDtypeStruct((b, L, D), f32),
        grid=(b, n_qb),
        in_specs=[
            pl.BlockSpec((1, tq, D), lambda bi, qi: (bi, qi, 0)),              # residual q
            pl.BlockSpec((1, n_head, tq, d_k), lambda bi, qi: (bi, 0, qi, 0)), # Qp block
            pl.BlockSpec((1, n_head, L, d_k), lambda bi, qi: (bi, 0, 0, 0)),   # Kp (invariant in qi)
            pl.BlockSpec((1, n_head, L, d_v), lambda bi, qi: (bi, 0, 0, 0)),   # Vp (invariant in qi)
            pl.BlockSpec((1, 1, L), lambda bi, qi: (bi, 0, 0)),                # key-mask bias
            pl.BlockSpec((1, tq, 1), lambda bi, qi: (bi, qi, 0)),              # query mask
            pl.BlockSpec((n_head, d_v, D), lambda bi, qi: (0, 0, 0)),          # fc (head-major)
            pl.BlockSpec((1, D), lambda bi, qi: (0, 0)),                       # ln gamma
            pl.BlockSpec((1, D), lambda bi, qi: (0, 0)),                       # ln beta
        ],
        out_specs=pl.BlockSpec((1, tq, D), lambda bi, qi: (bi, qi, 0)),
        compiler_params=cparams,
    )(q, Qp, Kp, Vp, kbias, qmask, wfc_hm, gamma2, beta2)


def reference_mha(q, k, v, mask, wq, wk, wv, wfc, gamma, beta,
                  *, n_head, d_k, d_v):
    """Pure-JAX f32 reference replicating the PyTorch forward (eval mode)."""
    b, L, D = q.shape
    Q = (q @ wq).reshape(b, L, n_head, d_k).transpose(0, 2, 1, 3)
    K = (k @ wk).reshape(b, L, n_head, d_k).transpose(0, 2, 1, 3)
    V = (v @ wv).reshape(b, L, n_head, d_v).transpose(0, 2, 1, 3)
    attn = jnp.einsum('bhqd,bhkd->bhqk', Q / (d_k ** 0.5), K)
    attn = jnp.where(mask[:, :, None, :] == 0, -1e9, attn)
    p = jax.nn.softmax(attn, axis=-1)
    out = jnp.einsum('bhqk,bhkd->bhqd', p, V)
    out = jnp.where(mask[:, :, :, None] == 0, 0.0, out)
    out = out.transpose(0, 2, 1, 3).reshape(b, L, n_head * d_v)
    out = out @ wfc + q
    mean = out.mean(-1, keepdims=True)
    var = ((out - mean) ** 2).mean(-1, keepdims=True)
    return (out - mean) / jnp.sqrt(var + 1e-6) * gamma + beta


if __name__ == "__main__":
    # Small shapes consistent with the module.
    B, L, D_MODEL = 2, 8, 32
    N_HEAD, D_K, D_V = 4, 8, 8

    key = jax.random.PRNGKey(0)
    ks = jax.random.split(key, 7)
    q = jax.random.normal(ks[0], (B, L, D_MODEL), dtype=jnp.float32)
    k = jax.random.normal(ks[1], (B, L, D_MODEL), dtype=jnp.float32)
    v = jax.random.normal(ks[2], (B, L, D_MODEL), dtype=jnp.float32)

    # Deterministic parameter init (shapes from MultiHeadAttention.__init__).
    scale = 1.0 / (D_MODEL ** 0.5)
    wq = jax.random.normal(ks[3], (D_MODEL, N_HEAD * D_K), dtype=jnp.float32) * scale
    wk = jax.random.normal(ks[4], (D_MODEL, N_HEAD * D_K), dtype=jnp.float32) * scale
    wv = jax.random.normal(ks[5], (D_MODEL, N_HEAD * D_V), dtype=jnp.float32) * scale
    wfc = jax.random.normal(ks[6], (N_HEAD * D_V, D_MODEL), dtype=jnp.float32) * scale
    gamma = jnp.ones((D_MODEL,), dtype=jnp.float32)   # LayerNorm weight
    beta = jnp.zeros((D_MODEL,), dtype=jnp.float32)   # LayerNorm bias

    # Padding-style mask: batch 1 has its last two positions masked out.
    mask = jnp.ones((B, 1, L), dtype=jnp.float32)
    mask = mask.at[1, 0, -2:].set(0.0)

    out = multi_head_attention(q, k, v, mask, wq, wk, wv, wfc, gamma, beta,
                               n_head=N_HEAD, d_k=D_K, d_v=D_V)
    out = jax.block_until_ready(out)

    ref = reference_mha(q, k, v, mask, wq, wk, wv, wfc, gamma, beta,
                        n_head=N_HEAD, d_k=D_K, d_v=D_V)
    assert out.shape == (B, L, D_MODEL)
    # bf16 matmul operands / bf16 cached K-V (f32 accumulation) vs pure-f32 ref.
    assert jnp.allclose(out, ref, atol=5e-2, rtol=5e-2), \
        f"max abs err {jnp.max(jnp.abs(out - ref))}"

    print("KERNEL_OK")
</pallas_src>

<mosaic_0001>
module attributes {stable_mosaic.version = 11 : i64} {
  func.func @qkv_proj_kernel(%arg0: i32, %arg1: i32, %arg2: memref<1x8x32xf32, #tpu.memory_space<vmem>>, %arg3: memref<1x8x32xf32, #tpu.memory_space<vmem>>, %arg4: memref<1x8x32xf32, #tpu.memory_space<vmem>>, %arg5: memref<4x32x8xbf16, #tpu.memory_space<vmem>>, %arg6: memref<4x32x8xbf16, #tpu.memory_space<vmem>>, %arg7: memref<4x32x8xbf16, #tpu.memory_space<vmem>>, %arg8: memref<1x4x8x8xbf16, #tpu.memory_space<vmem>>, %arg9: memref<1x4x8x8xbf16, #tpu.memory_space<vmem>>, %arg10: memref<1x4x8x8xbf16, #tpu.memory_space<vmem>>) attributes {dimension_semantics = [#tpu.dimension_semantics<parallel>, #tpu.dimension_semantics<parallel>], iteration_bounds = array<i64: 2, 1>, scalar_prefetch = 0 : i64, scratch_operands = 0 : i64, tpu.core_type = #tpu.core_type<tc>, window_params = [{transform_indices = @transform_0, window_bounds = array<i64: 1, 8, 32>}, {transform_indices = @transform_1, window_bounds = array<i64: 1, 8, 32>}, {transform_indices = @transform_2, window_bounds = array<i64: 1, 8, 32>}, {pipeline_mode = #tpu.pipeline_mode<synchronous>, transform_indices = @transform_3, window_bounds = array<i64: 4, 32, 8>}, {pipeline_mode = #tpu.pipeline_mode<synchronous>, transform_indices = @transform_4, window_bounds = array<i64: 4, 32, 8>}, {pipeline_mode = #tpu.pipeline_mode<synchronous>, transform_indices = @transform_5, window_bounds = array<i64: 4, 32, 8>}, {transform_indices = @transform_6, window_bounds = array<i64: 1, 4, 8, 8>}, {transform_indices = @transform_7, window_bounds = array<i64: 1, 4, 8, 8>}, {transform_indices = @transform_8, window_bounds = array<i64: 1, 4, 8, 8>}]} {
    %c0 = arith.constant 0 : index
    %c0_0 = arith.constant 0 : index
    %c0_1 = arith.constant 0 : index
    %0 = vector.load %arg2[%c0, %c0_0, %c0_1] : memref<1x8x32xf32, #tpu.memory_space<vmem>>, vector<1x8x32xf32>
    %1 = vector.shape_cast %0 : vector<1x8x32xf32> to vector<8x32xf32>
    %2 = arith.truncf %1 : vector<8x32xf32> to vector<8x32xbf16>
    %c0_2 = arith.constant 0 : index
    %c0_3 = arith.constant 0 : index
    %c0_4 = arith.constant 0 : index
    %3 = vector.load %arg3[%c0_2, %c0_3, %c0_4] : memref<1x8x32xf32, #tpu.memory_space<vmem>>, vector<1x8x32xf32>
    %4 = vector.shape_cast %3 : vector<1x8x32xf32> to vector<8x32xf32>
    %5 = arith.truncf %4 : vector<8x32xf32> to vector<8x32xbf16>
    %c0_5 = arith.constant 0 : index
    %c0_6 = arith.constant 0 : index
    %c0_7 = arith.constant 0 : index
    %6 = vector.load %arg4[%c0_5, %c0_6, %c0_7] : memref<1x8x32xf32, #tpu.memory_space<vmem>>, vector<1x8x32xf32>
    %7 = vector.shape_cast %6 : vector<1x8x32xf32> to vector<8x32xf32>
    %8 = arith.truncf %7 : vector<8x32xf32> to vector<8x32xbf16>
    %c0_8 = arith.constant 0 : index
    %c0_9 = arith.constant 0 : index
    %c0_10 = arith.constant 0 : index
    %9 = vector.load %arg5[%c0_8, %c0_9, %c0_10] : memref<4x32x8xbf16, #tpu.memory_space<vmem>>, vector<1x32x8xbf16>
    %10 = vector.shape_cast %9 : vector<1x32x8xbf16> to vector<32x8xbf16>
    %cst = arith.constant dense<0.000000e+00> : vector<8x8xf32>
    %11 = tpu.matmul %2, %10, %cst {dimension_numbers = #tpu.dot_dimension_numbers<[1], [0], [0], [1], [0, 0, 1, 1], [], []>} : vector<8x32xbf16>, vector<32x8xbf16>, vector<8x8xf32> -> vector<8x8xf32>
    %12 = arith.truncf %11 : vector<8x8xf32> to vector<8x8xbf16>
    %c0_11 = arith.constant 0 : index
    %c0_12 = arith.constant 0 : index
    %c0_13 = arith.constant 0 : index
    %c0_14 = arith.constant 0 : index
    %13 = vector.load %arg8[%c0_11, %c0_12, %c0_13, %c0_14] : memref<1x4x8x8xbf16, #tpu.memory_space<vmem>>, vector<1x1x8x8xbf16>
    %14 = vector.shape_cast %13 : vector<1x1x8x8xbf16> to vector<8x8xbf16>
    %15 = vector.shape_cast %12 : vector<8x8xbf16> to vector<1x1x8x8xbf16>
    tpu.vector_store %arg8[%c0_11, %c0_12, %c0_13, %c0_14], %15 {strides = array<i32>} : memref<1x4x8x8xbf16, #tpu.memory_space<vmem>>, vector<1x1x8x8xbf16>,
    %c0_15 = arith.constant 0 : index
    %c0_16 = arith.constant 0 : index
    %c0_17 = arith.constant 0 : index
    %16 = vector.load %arg6[%c0_15, %c0_16, %c0_17] : memref<4x32x8xbf16, #tpu.memory_space<vmem>>, vector<1x32x8xbf16>
    %17 = vector.shape_cast %16 : vector<1x32x8xbf16> to vector<32x8xbf16>
    %cst_18 = arith.constant dense<0.000000e+00> : vector<8x8xf32>
    %18 = tpu.matmul %5, %17, %cst_18 {dimension_numbers = #tpu.dot_dimension_numbers<[1], [0], [0], [1], [0, 0, 1, 1], [], []>} : vector<8x32xbf16>, vector<32x8xbf16>, vector<8x8xf32> -> vector<8x8xf32>
    %19 = arith.truncf %18 : vector<8x8xf32> to vector<8x8xbf16>
    %c0_19 = arith.constant 0 : index
    %c0_20 = arith.constant 0 : index
    %c0_21 = arith.constant 0 : index
    %c0_22 = arith.constant 0 : index
    %20 = vector.load %arg9[%c0_19, %c0_20, %c0_21, %c0_22] : memref<1x4x8x8xbf16, #tpu.memory_space<vmem>>, vector<1x1x8x8xbf16>
    %21 = vector.shape_cast %20 : vector<1x1x8x8xbf16> to vector<8x8xbf16>
    %22 = vector.shape_cast %19 : vector<8x8xbf16> to vector<1x1x8x8xbf16>
    tpu.vector_store %arg9[%c0_19, %c0_20, %c0_21, %c0_22], %22 {strides = array<i32>} : memref<1x4x8x8xbf16, #tpu.memory_space<vmem>>, vector<1x1x8x8xbf16>,
    %c0_23 = arith.constant 0 : index
    %c0_24 = arith.constant 0 : index
    %c0_25 = arith.constant 0 : index
    %23 = vector.load %arg7[%c0_23, %c0_24, %c0_25] : memref<4x32x8xbf16, #tpu.memory_space<vmem>>, vector<1x32x8xbf16>
    %24 = vector.shape_cast %23 : vector<1x32x8xbf16> to vector<32x8xbf16>
    %cst_26 = arith.constant dense<0.000000e+00> : vector<8x8xf32>
    %25 = tpu.matmul %8, %24, %cst_26 {dimension_numbers = #tpu.dot_dimension_numbers<[1], [0], [0], [1], [0, 0, 1, 1], [], []>} : vector<8x32xbf16>, vector<32x8xbf16>, vector<8x8xf32> -> vector<8x8xf32>
    %26 = arith.truncf %25 : vector<8x8xf32> to vector<8x8xbf16>
    %c0_27 = arith.constant 0 : index
    %c0_28 = arith.constant 0 : index
    %c0_29 = arith.constant 0 : index
    %c0_30 = arith.constant 0 : index
    %27 = vector.load %arg10[%c0_27, %c0_28, %c0_29, %c0_30] : memref<1x4x8x8xbf16, #tpu.memory_space<vmem>>, vector<1x1x8x8xbf16>
    %28 = vector.shape_cast %27 : vector<1x1x8x8xbf16> to vector<8x8xbf16>
    %29 = vector.shape_cast %26 : vector<8x8xbf16> to vector<1x1x8x8xbf16>
    tpu.vector_store %arg10[%c0_27, %c0_28, %c0_29, %c0_30], %29 {strides = array<i32>} : memref<1x4x8x8xbf16, #tpu.memory_space<vmem>>, vector<1x1x8x8xbf16>,
    %c1 = arith.constant 1 : index
    %c0_31 = arith.constant 0 : index
    %c0_32 = arith.constant 0 : index
    %30 = vector.load %arg5[%c1, %c0_31, %c0_32] : memref<4x32x8xbf16, #tpu.memory_space<vmem>>, vector<1x32x8xbf16>
    %31 = vector.shape_cast %30 : vector<1x32x8xbf16> to vector<32x8xbf16>
    %cst_33 = arith.constant dense<0.000000e+00> : vector<8x8xf32>
    %32 = tpu.matmul %2, %31, %cst_33 {dimension_numbers = #tpu.dot_dimension_numbers<[1], [0], [0], [1], [0, 0, 1, 1], [], []>} : vector<8x32xbf16>, vector<32x8xbf16>, vector<8x8xf32> -> vector<8x8xf32>
    %33 = arith.truncf %32 : vector<8x8xf32> to vector<8x8xbf16>
    %c0_34 = arith.constant 0 : index
    %c1_35 = arith.constant 1 : index
    %c0_36 = arith.constant 0 : index
    %c0_37 = arith.constant 0 : index
    %34 = vector.load %arg8[%c0_34, %c1_35, %c0_36, %c0_37] : memref<1x4x8x8xbf16, #tpu.memory_space<vmem>>, vector<1x1x8x8xbf16>
    %35 = vector.shape_cast %34 : vector<1x1x8x8xbf16> to vector<8x8xbf16>
    %36 = vector.shape_cast %33 : vector<8x8xbf16> to vector<1x1x8x8xbf16>
    tpu.vector_store %arg8[%c0_34, %c1_35, %c0_36, %c0_37], %36 {strides = array<i32>} : memref<1x4x8x8xbf16, #tpu.memory_space<vmem>>, vector<1x1x8x8xbf16>,
    %c1_38 = arith.constant 1 : index
    %c0_39 = arith.constant 0 : index
    %c0_40 = arith.constant 0 : index
    %37 = vector.load %arg6[%c1_38, %c0_39, %c0_40] : memref<4x32x8xbf16, #tpu.memory_space<vmem>>, vector<1x32x8xbf16>
    %38 = vector.shape_cast %37 : vector<1x32x8xbf16> to vector<32x8xbf16>
    %cst_41 = arith.constant dense<0.000000e+00> : vector<8x8xf32>
    %39 = tpu.matmul %5, %38, %cst_41 {dimension_numbers = #tpu.dot_dimension_numbers<[1], [0], [0], [1], [0, 0, 1, 1], [], []>} : vector<8x32xbf16>, vector<32x8xbf16>, vector<8x8xf32> -> vector<8x8xf32>
    %40 = arith.truncf %39 : vector<8x8xf32> to vector<8x8xbf16>
    %c0_42 = arith.constant 0 : index
    %c1_43 = arith.constant 1 : index
    %c0_44 = arith.constant 0 : index
    %c0_45 = arith.constant 0 : index
    %41 = vector.load %arg9[%c0_42, %c1_43, %c0_44, %c0_45] : memref<1x4x8x8xbf16, #tpu.memory_space<vmem>>, vector<1x1x8x8xbf16>
    %42 = vector.shape_cast %41 : vector<1x1x8x8xbf16> to vector<8x8xbf16>
    %43 = vector.shape_cast %40 : vector<8x8xbf16> to vector<1x1x8x8xbf16>
    tpu.vector_store %arg9[%c0_42, %c1_43, %c0_44, %c0_45], %43 {strides = array<i32>} : memref<1x4x8x8xbf16, #tpu.memory_space<vmem>>, vector<1x1x8x8xbf16>,
    %c1_46 = arith.constant 1 : index
    %c0_47 = arith.constant 0 : index
    %c0_48 = arith.constant 0 : index
    %44 = vector.load %arg7[%c1_46, %c0_47, %c0_48] : memref<4x32x8xbf16, #tpu.memory_space<vmem>>, vector<1x32x8xbf16>
    %45 = vector.shape_cast %44 : vector<1x32x8xbf16> to vector<32x8xbf16>
    %cst_49 = arith.constant dense<0.000000e+00> : vector<8x8xf32>
    %46 = tpu.matmul %8, %45, %cst_49 {dimension_numbers = #tpu.dot_dimension_numbers<[1], [0], [0], [1], [0, 0, 1, 1], [], []>} : vector<8x32xbf16>, vector<32x8xbf16>, vector<8x8xf32> -> vector<8x8xf32>
    %47 = arith.truncf %46 : vector<8x8xf32> to vector<8x8xbf16>
    %c0_50 = arith.constant 0 : index
    %c1_51 = arith.constant 1 : index
    %c0_52 = arith.constant 0 : index
    %c0_53 = arith.constant 0 : index
    %48 = vector.load %arg10[%c0_50, %c1_51, %c0_52, %c0_53] : memref<1x4x8x8xbf16, #tpu.memory_space<vmem>>, vector<1x1x8x8xbf16>
    %49 = vector.shape_cast %48 : vector<1x1x8x8xbf16> to vector<8x8xbf16>
    %50 = vector.shape_cast %47 : vector<8x8xbf16> to vector<1x1x8x8xbf16>
    tpu.vector_store %arg10[%c0_50, %c1_51, %c0_52, %c0_53], %50 {strides = array<i32>} : memref<1x4x8x8xbf16, #tpu.memory_space<vmem>>, vector<1x1x8x8xbf16>,
    %c2 = arith.constant 2 : index
    %c0_54 = arith.constant 0 : index
    %c0_55 = arith.constant 0 : index
    %51 = vector.load %arg5[%c2, %c0_54, %c0_55] : memref<4x32x8xbf16, #tpu.memory_space<vmem>>, vector<1x32x8xbf16>
    %52 = vector.shape_cast %51 : vector<1x32x8xbf16> to vector<32x8xbf16>
    %cst_56 = arith.constant dense<0.000000e+00> : vector<8x8xf32>
    %53 = tpu.matmul %2, %52, %cst_56 {dimension_numbers = #tpu.dot_dimension_numbers<[1], [0], [0], [1], [0, 0, 1, 1], [], []>} : vector<8x32xbf16>, vector<32x8xbf16>, vector<8x8xf32> -> vector<8x8xf32>
    %54 = arith.truncf %53 : vector<8x8xf32> to vector<8x8xbf16>
    %c0_57 = arith.constant 0 : index
    %c2_58 = arith.constant 2 : index
    %c0_59 = arith.constant 0 : index
    %c0_60 = arith.constant 0 : index
    %55 = vector.load %arg8[%c0_57, %c2_58, %c0_59, %c0_60] : memref<1x4x8x8xbf16, #tpu.memory_space<vmem>>, vector<1x1x8x8xbf16>
    %56 = vector.shape_cast %55 : vector<1x1x8x8xbf16> to vector<8x8xbf16>
    %57 = vector.shape_cast %54 : vector<8x8xbf16> to vector<1x1x8x8xbf16>
    tpu.vector_store %arg8[%c0_57, %c2_58, %c0_59, %c0_60], %57 {strides = array<i32>} : memref<1x4x8x8xbf16, #tpu.memory_space<vmem>>, vector<1x1x8x8xbf16>,
    %c2_61 = arith.constant 2 : index
    %c0_62 = arith.constant 0 : index
    %c0_63 = arith.constant 0 : index
    %58 = vector.load %arg6[%c2_61, %c0_62, %c0_63] : memref<4x32x8xbf16, #tpu.memory_space<vmem>>, vector<1x32x8xbf16>
    %59 = vector.shape_cast %58 : vector<1x32x8xbf16> to vector<32x8xbf16>
    %cst_64 = arith.constant dense<0.000000e+00> : vector<8x8xf32>
    %60 = tpu.matmul %5, %59, %cst_64 {dimension_numbers = #tpu.dot_dimension_numbers<[1], [0], [0], [1], [0, 0, 1, 1], [], []>} : vector<8x32xbf16>, vector<32x8xbf16>, vector<8x8xf32> -> vector<8x8xf32>
    %61 = arith.truncf %60 : vector<8x8xf32> to vector<8x8xbf16>
    %c0_65 = arith.constant 0 : index
    %c2_66 = arith.constant 2 : index
    %c0_67 = arith.constant 0 : index
    %c0_68 = arith.constant 0 : index
    %62 = vector.load %arg9[%c0_65, %c2_66, %c0_67, %c0_68] : memref<1x4x8x8xbf16, #tpu.memory_space<vmem>>, vector<1x1x8x8xbf16>
    %63 = vector.shape_cast %62 : vector<1x1x8x8xbf16> to vector<8x8xbf16>
    %64 = vector.shape_cast %61 : vector<8x8xbf16> to vector<1x1x8x8xbf16>
    tpu.vector_store %arg9[%c0_65, %c2_66, %c0_67, %c0_68], %64 {strides = array<i32>} : memref<1x4x8x8xbf16, #tpu.memory_space<vmem>>, vector<1x1x8x8xbf16>,
    %c2_69 = arith.constant 2 : index
    %c0_70 = arith.constant 0 : index
    %c0_71 = arith.constant 0 : index
    %65 = vector.load %arg7[%c2_69, %c0_70, %c0_71] : memref<4x32x8xbf16, #tpu.memory_space<vmem>>, vector<1x32x8xbf16>
    %66 = vector.shape_cast %65 : vector<1x32x8xbf16> to vector<32x8xbf16>
    %cst_72 = arith.constant dense<0.000000e+00> : vector<8x8xf32>
    %67 = tpu.matmul %8, %66, %cst_72 {dimension_numbers = #tpu.dot_dimension_numbers<[1], [0], [0], [1], [0, 0, 1, 1], [], []>} : vector<8x32xbf16>, vector<32x8xbf16>, vector<8x8xf32> -> vector<8x8xf32>
    %68 = arith.truncf %67 : vector<8x8xf32> to vector<8x8xbf16>
    %c0_73 = arith.constant 0 : index
    %c2_74 = arith.constant 2 : index
    %c0_75 = arith.constant 0 : index
    %c0_76 = arith.constant 0 : index
    %69 = vector.load %arg10[%c0_73, %c2_74, %c0_75, %c0_76] : memref<1x4x8x8xbf16, #tpu.memory_space<vmem>>, vector<1x1x8x8xbf16>
    %70 = vector.shape_cast %69 : vector<1x1x8x8xbf16> to vector<8x8xbf16>
    %71 = vector.shape_cast %68 : vector<8x8xbf16> to vector<1x1x8x8xbf16>
    tpu.vector_store %arg10[%c0_73, %c2_74, %c0_75, %c0_76], %71 {strides = array<i32>} : memref<1x4x8x8xbf16, #tpu.memory_space<vmem>>, vector<1x1x8x8xbf16>,
    %c3 = arith.constant 3 : index
    %c0_77 = arith.constant 0 : index
    %c0_78 = arith.constant 0 : index
    %72 = vector.load %arg5[%c3, %c0_77, %c0_78] : memref<4x32x8xbf16, #tpu.memory_space<vmem>>, vector<1x32x8xbf16>
    %73 = vector.shape_cast %72 : vector<1x32x8xbf16> to vector<32x8xbf16>
    %cst_79 = arith.constant dense<0.000000e+00> : vector<8x8xf32>
    %74 = tpu.matmul %2, %73, %cst_79 {dimension_numbers = #tpu.dot_dimension_numbers<[1], [0], [0], [1], [0, 0, 1, 1], [], []>} : vector<8x32xbf16>, vector<32x8xbf16>, vector<8x8xf32> -> vector<8x8xf32>
    %75 = arith.truncf %74 : vector<8x8xf32> to vector<8x8xbf16>
    %c0_80 = arith.constant 0 : index
    %c3_81 = arith.constant 3 : index
    %c0_82 = arith.constant 0 : index
    %c0_83 = arith.constant 0 : index
    %76 = vector.load %arg8[%c0_80, %c3_81, %c0_82, %c0_83] : memref<1x4x8x8xbf16, #tpu.memory_space<vmem>>, vector<1x1x8x8xbf16>
    %77 = vector.shape_cast %76 : vector<1x1x8x8xbf16> to vector<8x8xbf16>
    %78 = vector.shape_cast %75 : vector<8x8xbf16> to vector<1x1x8x8xbf16>
    tpu.vector_store %arg8[%c0_80, %c3_81, %c0_82, %c0_83], %78 {strides = array<i32>} : memref<1x4x8x8xbf16, #tpu.memory_space<vmem>>, vector<1x1x8x8xbf16>,
    %c3_84 = arith.constant 3 : index
    %c0_85 = arith.constant 0 : index
    %c0_86 = arith.constant 0 : index
    %79 = vector.load %arg6[%c3_84, %c0_85, %c0_86] : memref<4x32x8xbf16, #tpu.memory_space<vmem>>, vector<1x32x8xbf16>
    %80 = vector.shape_cast %79 : vector<1x32x8xbf16> to vector<32x8xbf16>
    %cst_87 = arith.constant dense<0.000000e+00> : vector<8x8xf32>
    %81 = tpu.matmul %5, %80, %cst_87 {dimension_numbers = #tpu.dot_dimension_numbers<[1], [0], [0], [1], [0, 0, 1, 1], [], []>} : vector<8x32xbf16>, vector<32x8xbf16>, vector<8x8xf32> -> vector<8x8xf32>
    %82 = arith.truncf %81 : vector<8x8xf32> to vector<8x8xbf16>
    %c0_88 = arith.constant 0 : index
    %c3_89 = arith.constant 3 : index
    %c0_90 = arith.constant 0 : index
    %c0_91 = arith.constant 0 : index
    %83 = vector.load %arg9[%c0_88, %c3_89, %c0_90, %c0_91] : memref<1x4x8x8xbf16, #tpu.memory_space<vmem>>, vector<1x1x8x8xbf16>
    %84 = vector.shape_cast %83 : vector<1x1x8x8xbf16> to vector<8x8xbf16>
    %85 = vector.shape_cast %82 : vector<8x8xbf16> to vector<1x1x8x8xbf16>
    tpu.vector_store %arg9[%c0_88, %c3_89, %c0_90, %c0_91], %85 {strides = array<i32>} : memref<1x4x8x8xbf16, #tpu.memory_space<vmem>>, vector<1x1x8x8xbf16>,
    %c3_92 = arith.constant 3 : index
    %c0_93 = arith.constant 0 : index
    %c0_94 = arith.constant 0 : index
    %86 = vector.load %arg7[%c3_92, %c0_93, %c0_94] : memref<4x32x8xbf16, #tpu.memory_space<vmem>>, vector<1x32x8xbf16>
    %87 = vector.shape_cast %86 : vector<1x32x8xbf16> to vector<32x8xbf16>
    %cst_95 = arith.constant dense<0.000000e+00> : vector<8x8xf32>
    %88 = tpu.matmul %8, %87, %cst_95 {dimension_numbers = #tpu.dot_dimension_numbers<[1], [0], [0], [1], [0, 0, 1, 1], [], []>} : vector<8x32xbf16>, vector<32x8xbf16>, vector<8x8xf32> -> vector<8x8xf32>
    %89 = arith.truncf %88 : vector<8x8xf32> to vector<8x8xbf16>
    %c0_96 = arith.constant 0 : index
    %c3_97 = arith.constant 3 : index
    %c0_98 = arith.constant 0 : index
    %c0_99 = arith.constant 0 : index
    %90 = vector.load %arg10[%c0_96, %c3_97, %c0_98, %c0_99] : memref<1x4x8x8xbf16, #tpu.memory_space<vmem>>, vector<1x1x8x8xbf16>
    %91 = vector.shape_cast %90 : vector<1x1x8x8xbf16> to vector<8x8xbf16>
    %92 = vector.shape_cast %89 : vector<8x8xbf16> to vector<1x1x8x8xbf16>
    tpu.vector_store %arg10[%c0_96, %c3_97, %c0_98, %c0_99], %92 {strides = array<i32>} : memref<1x4x8x8xbf16, #tpu.memory_space<vmem>>, vector<1x1x8x8xbf16>,
    return
  }
  func.func @transform_0(%arg0: i32, %arg1: i32) -> (i32, i32, i32) {
    %c0_i32 = arith.constant 0 : i32
    %c0_i32_0 = arith.constant 0 : i32
    return %arg0, %arg1, %c0_i32 : i32, i32, i32
  }
  func.func @transform_1(%arg0: i32, %arg1: i32) -> (i32, i32, i32) {
    %c0_i32 = arith.constant 0 : i32
    %c0_i32_0 = arith.constant 0 : i32
    return %arg0, %arg1, %c0_i32 : i32, i32, i32
  }
  func.func @transform_2(%arg0: i32, %arg1: i32) -> (i32, i32, i32) {
    %c0_i32 = arith.constant 0 : i32
    %c0_i32_0 = arith.constant 0 : i32
    return %arg0, %arg1, %c0_i32 : i32, i32, i32
  }
  func.func @transform_3(%arg0: i32, %arg1: i32) -> (i32, i32, i32) {
    %c0_i32 = arith.constant 0 : i32
    %c0_i32_0 = arith.constant 0 : i32
    %c0_i32_1 = arith.constant 0 : i32
    %c0_i32_2 = arith.constant 0 : i32
    return %c0_i32, %c0_i32_0, %c0_i32_1 : i32, i32, i32
  }
  func.func @transform_4(%arg0: i32, %arg1: i32) -> (i32, i32, i32) {
    %c0_i32 = arith.constant 0 : i32
    %c0_i32_0 = arith.constant 0 : i32
    %c0_i32_1 = arith.constant 0 : i32
    %c0_i32_2 = arith.constant 0 : i32
    return %c0_i32, %c0_i32_0, %c0_i32_1 : i32, i32, i32
  }
  func.func @transform_5(%arg0: i32, %arg1: i32) -> (i32, i32, i32) {
    %c0_i32 = arith.constant 0 : i32
    %c0_i32_0 = arith.constant 0 : i32
    %c0_i32_1 = arith.constant 0 : i32
    %c0_i32_2 = arith.constant 0 : i32
    return %c0_i32, %c0_i32_0, %c0_i32_1 : i32, i32, i32
  }
  func.func @transform_6(%arg0: i32, %arg1: i32) -> (i32, i32, i32, i32) {
    %c0_i32 = arith.constant 0 : i32
    %c0_i32_0 = arith.constant 0 : i32
    %c0_i32_1 = arith.constant 0 : i32
    return %arg0, %c0_i32, %arg1, %c0_i32_0 : i32, i32, i32, i32
  }
  func.func @transform_7(%arg0: i32, %arg1: i32) -> (i32, i32, i32, i32) {
    %c0_i32 = arith.constant 0 : i32
    %c0_i32_0 = arith.constant 0 : i32
    %c0_i32_1 = arith.constant 0 : i32
    return %arg0, %c0_i32, %arg1, %c0_i32_0 : i32, i32, i32, i32
  }
  func.func @transform_8(%arg0: i32, %arg1: i32) -> (i32, i32, i32, i32) {
    %c0_i32 = arith.constant 0 : i32
    %c0_i32_0 = arith.constant 0 : i32
    %c0_i32_1 = arith.constant 0 : i32
    return %arg0, %c0_i32, %arg1, %c0_i32_0 : i32, i32, i32, i32
  }
}

</mosaic_0001>

<bundles_post_ra>
// kernel: tpu_custom_call.1
= control target key start
LH: loop header
LB: loop body
LE: loop exit
PB: predicated region body
PF: predicated region fallthrough
CT: control target
= control target key end

     0   :  { %s2272_s0 = inlined_call_operand.vmem [shape: f32[2,8,32], index: 0, kind: input, shape index: {}]   ;;  %s2273_s1 = inlined_call_operand.vmem [shape: f32[2,8,32], index: 1, kind: input, shape index: {}]   ;;  %s2274_s2 = inlined_call_operand.vmem [shape: f32[2,8,32], index: 2, kind: input, shape index: {}]   ;;  %s2275_s3 = inlined_call_operand.vmem [shape: bf16[4,32,8], index: 3, kind: input, shape index: {}]   ;;  %s2276_s4 = inlined_call_operand.vmem [shape: bf16[4,32,8], index: 4, kind: input, shape index: {}]   ;;  %s2277_s5 = inlined_call_operand.vmem [shape: bf16[4,32,8], index: 5, kind: input, shape index: {}]   ;;  %s2278_s6 = inlined_call_operand.hbm [shape: bf16[2,4,8,8], index: 6, kind: output, shape index: {0}]   ;;  %s2279_s7 = inlined_call_operand.hbm [shape: bf16[2,4,8,8], index: 7, kind: output, shape index: {1}]   ;;  %s2280_s8 = inlined_call_operand.hbm [shape: bf16[2,4,8,8], index: 8, kind: output, shape index: {2}]  }
   0x1   :  { %2287 = sst [smem:[#allocation9_spill]] %s2272_s0 }
   0x2   :  { %2288 = sst [smem:[#allocation10_spill]] %s2273_s1 }
   0x3   :  { %14 = vsyncpa [#allocation3], 0 }
   0x4   :  { %16 = vsyncpa [#allocation3 + $0x1], 0 }
   0x5   :  { %17 = vsyncpa [#allocation5], 0 }
   0x6   :  { %19 = vsyncpa [#allocation5 + $0x1], 0  ;;  %s1882_s27 = smov 0   ;;  %s1884_s28 = smov 0  }
   0x7   :  { %s1886_s29 = smov 0   ;;  %s1888_s30 = smov 0  }
   0x8   :  { %s1890_s9 = smov 0   ;;  %s1892_s10 = smov 0  }
   0x9 LB: > { %s2282_s11 = sadd.s32 4294967295, %s1828_s10   ;;  %s2281_s12 = sadd.s32 4294967294, %s1828_s10   ;;  %s1828_s10 = sphi %s1892_s10, %s25_s10   ;;  %s1824_s9 = sphi %s1890_s9, %s2301_s9   ;;  %s1820_s30 = sphi %s1888_s30, %s2300_s30   ;;  %s1816_s29 = sphi %s1886_s29, %s2299_s29   ;;  %s1812_s28 = sphi %s1884_s28, %s2298_s28   ;;  %s1808_s27 = sphi %s1882_s27, %s2297_s27  }
   0xa   : > { %s37_s13 = sadd.s32 1, %s1824_s9  ;;  %s193_s14 = sadd.s32 1, %s1816_s29 }
   0xb   : > { %p39_p0 = scmp.ge.s32.totalorder %s37_s13, 2  ;;  %p203_p1 = scmp.ne.s32.totalorder %s1816_s29, %s1812_s28 }
   0xc   : > { %p204_p2 = scmp.eq.s32.totalorder %s2282_s11, 1  ;;  %p209_p3 = scmp.ne.s32.totalorder %s1812_s28, %s1808_s27 }
   0xd   : > { %s2303_s13 = smov (%p39_p0, %s37_s13), 0  ;;  %p210_p5 = scmp.eq.s32.totalorder %s2281_s12, 1 }
   0xe   : > { %p1924_p4 = por %p204_p2, %p203_p1  ;;  %s188_s16 = ssub.s32 %s1824_s9, %s2303_s13 }
   0xf   : > { %p1369_p6 = scmp.ge.s32.totalorder %s1828_s10, 1  ;;  %p191_p7 = scmp.eq.s32.totalorder %s188_s16, 0 }
  0x10   : > { %p1933_p8 = por %p210_p5, %p209_p3  ;;  %p323_p9 = scmp.lt.s32.totalorder %s1828_s10, 3 }
  0x11   : > { %s1939_s18 = scalar_select %p191_p7, %s1816_s29, %s193_s14  }
  0x12   : > { %p324_p10 = pnand %p1369_p6, %p323_p9 }
  0x13   : > { %p383_p11 = scmp.lt.s32.totalorder (!%p324_p10), %s1820_s30, 1  ;;  %s2291_s0 = sld [smem:[#allocation9_spill]] (!%p324_p10) }
  0x14   : > { %327 = sbr.rel (%p324_p10) target bundleno = 324 (0x144), region = 44  ;;  %s2292_s1 = sld [smem:[#allocation10_spill]] (!%p324_p10) }
  0x15   : > { %s366_s21 = sand.u32 (!%p324_p10), 1, %s1812_s28   ;;  %s2129_s24 = sshll.u32 (!%p324_p10), %s1820_s30, 8 }
  0x16   : > { %s1370_s22 = sshll.u32 (!%p324_p10), %s366_s21, 4 }
  0x17   : > { %s2105_s11 = scalar_lea.vmem (!%p324_p10), [#allocation2], %s1370_s22  ;;  %s2109_s12 = scalar_lea.vmem (!%p324_p10), [#allocation4], %s1370_s22 }
  0x19   : > { %v1672_v0 = vld [vmem:[%s2275_s3 + $0x8] sm:$0xff]   ;;  %v1830_v1 = vmov 0.0   ;;  %v1674_v3 = vld [vmem:[%s2275_s3] sm:$0xff]   ;;  %vm1831_vm0 = vmmov 0   ;;  %s384_s14 = scalar_select %p383_p11, %s1820_s30, 1  ;;  %v1677_v6 = vld [vmem:[%s2275_s3 + $0x18] sm:$0xff]  }
  0x1a   : > { %1507 = vmatprep.subr.bf16.mxu0 %v1830_v1  ;;  %1515 = vmatprep.subr.bf16.mxu1 %v1830_v1  ;;  %v1673_v2 = vld [vmem:[%s2276_s4 + $0x8] sm:$0xff]   ;;  %v1675_v4 = vld [vmem:[%s2276_s4] sm:$0xff]   ;;  %vm427_vm1 = vcmask 261120   ;;  %v1679_v12 = vld [vmem:[%s2275_s3 + $0x10] sm:$0xff]   ;;  %vm472_vm2 = vcmask 60416   ;;  %s2145_s30 = scalar_lea.sflag [#allocation3], %s366_s21 }
  0x1b   : > { %1508 = vmatpush3.bf16.msra.mxu0 %v1672_v0  ;;  %1511 = vmatprep.mubr.msk.bf16.mxu0 %vm1831_vm0, %v1830_v1  ;;  %s1373_s16 = sshll.u32 %s384_s14, 3  ;;  %v1676_v5 = vld [vmem:[%s2277_s5 + $0x8] sm:$0xff]   ;;  %v1678_v11 = vld [vmem:[%s2277_s5] sm:$0xff]   ;;  %v1680_v15 = vld [vmem:[%s2276_s4 + $0x18] sm:$0xff]   ;;  %s2137_s14 = scalar_lea.hbm %s2278_s6, %s2129_s24 }
  0x1c   : > { %1516 = vmatpush3.bf16.msra.mxu1 %v1673_v2  ;;  %1509 = vmatprep.subr.bf16.mxu0 %v1830_v1  ;;  %s389_s23 = scalar_lea.vmem %s2291_s0, %s1373_s16  ;;  %s396_s26 = scalar_lea.vmem %s2292_s1, %s1373_s16  ;;  %v1681_v16 = vld [vmem:[%s2277_s5 + $0x18] sm:$0xff]   ;;  %v1682_v17 = vld [vmem:[%s2276_s4 + $0x10] sm:$0xff]   ;;  %v1684_v19 = vld [vmem:[%s2275_s3 + $0x28] sm:$0xff]  }
  0x1d   : > { %1517 = vmatprep.subr.bf16.mxu1 %v1830_v1  ;;  %1519 = vmatprep.mubr.msk.bf16.mxu1 %vm1831_vm0, %v1830_v1  ;;  %v405_v7 = vld [vmem:[%s389_s23] sm:$0xff]  ;;  %s403_s20 = scalar_lea.vmem %s2274_s2, %s1373_s16  ;;  %v1683_v18 = vld [vmem:[%s2277_s5 + $0x10] sm:$0xff]   ;;  %v1685_v20 = vld [vmem:[%s2276_s4 + $0x28] sm:$0xff]   ;;  %s2113_s16 = scalar_lea.vmem [#allocation6], %s1370_s22 }
  0x1e   : > { %v407_v8 = vld [vmem:[%s396_s26] sm:$0xff]  ;;  %v1977_v9 = vpack.c.bf16 %v405_v7, %v405_v7  ;;  %v1688_v23 = vld [vmem:[%s2277_s5 + $0x28] sm:$0xff]   ;;  %v1689_v24 = vld [vmem:[%s2275_s3 + $0x38] sm:$0xff]   ;;  %s1161_s23 = sshll.u32 %s2105_s11, 4  ;;  %s2131_s23 = int_to_ptr.vmem [resolvable:$true] %s1161_s23 }
  0x1f   : > { %1510 = vmatpush3.bf16.msra.mxu0 %v1674_v3  ;;  %v1979_v10 = vpack.c.bf16 %v407_v8, %v407_v8  ;;  %v409_v13 = vld [vmem:[%s403_s20] sm:$0xff]  ;;  %v1691_v26 = vld [vmem:[%s2275_s3 + $0x30] sm:$0xff]   ;;  %v1692_v27 = vld [vmem:[%s2276_s4 + $0x38] sm:$0xff]   ;;  %s1696_s19 = scalar_lea.vmem %s2131_s23, 256  ;;  %s1832_s20 = smov [#allocation2]  }
  0x20   : > { %1518 = vmatpush3.bf16.msra.mxu1 %v1675_v4  ;;  %1523 = vmatprep.subr.bf16.mxu0 %v1830_v1  ;;  %v2000_v14 = vpack.c.bf16 %v409_v13, %v409_v13  ;;  %v1686_v21 = vld [vmem:[%s2275_s3 + $0x20] sm:$0xff]   ;;  %v1693_v28 = vld [vmem:[%s2277_s5 + $0x38] sm:$0xff]   ;;  %v1694_v29 = vld [vmem:[%s2276_s4 + $0x30] sm:$0xff]   ;;  %p1697_p12 = scmp.ne.s32.totalorder %s2131_s23, %s1696_s19  ;;  %s1700_s22 = sshll.u32 %s1832_s20, 4  ;;  %s1701_s22 = int_to_ptr.vmem [resolvable:$false] %s1700_s22 }
  0x21   : > { %1531 = vmatprep.subr.bf16.mxu1 %v1830_v1  ;;  %v1687_v22 = vld [vmem:[%s2276_s4 + $0x20] sm:$0xff]   ;;  %v1695_v30 = vld [vmem:[%s2277_s5 + $0x30] sm:$0xff]   ;;  %s1702_s25 = scalar_lea.vmem %s1701_s22, 512  ;;  %p1703_p1 = scmp.lt.s32.totalorder %s2131_s23, %s1701_s22 }
  0x22   : > { %1512 = vmatmul.mubr.msk.bf16.vlgmr.msra.gmra.mxu0 %vm427_vm1, %v1977_v9  ;;  %v1690_v25 = vld [vmem:[%s2277_s5 + $0x20] sm:$0xff]   ;;  %p1698_p13 = pnand %p1697_p12, %p1924_p4  ;;  %p1704_p2 = scmp.lt.s32.totalorder %s1702_s25, %s1696_s19 }
  0x23   : > { %1520 = vmatmul.mubr.msk.bf16.vlgmr.msra.gmra.mxu1 %vm427_vm1, %v1979_v10  ;;  %1524 = vmatpush3.bf16.msra.mxu0 %v1676_v5 }
  0x24   : > { %1532 = vmatpush3.bf16.msra.mxu1 %v1677_v6  ;;  %1525 = vmatprep.subr.bf16.mxu0 %v1830_v1  ;;  %p1699_p0 = pneg %p1698_p13  ;;  %p1705_p3 = por %p1704_p2, %p1703_p1 }
  0x25   : > { %1533 = vmatprep.subr.bf16.mxu1 %v1830_v1  ;;  %1527 = vmatprep.mubr.msk.bf16.mxu0 %vm1831_vm0, %v1830_v1 }
  0x26   : > { %1535 = vmatprep.mubr.msk.bf16.mxu1 %vm1831_vm0, %v1830_v1  ;;  %p1706_p5 = pnand %p1705_p3, %p1699_p0 }
  0x27   : > { %1526 = vmatpush3.bf16.msra.mxu0 %v1678_v11 }
  0x28   : > { %1534 = vmatpush3.bf16.msra.mxu1 %v1679_v12  ;;  %1539 = vmatprep.subr.bf16.mxu0 %v1830_v1 }
  0x29   : > { %1547 = vmatprep.subr.bf16.mxu1 %v1830_v1 }
  0x2a   : > { %1528 = vmatmul.mubr.msk.bf16.vlgmr.msra.gmra.mxu0 %vm427_vm1, %v2000_v14 }
  0x2b   : > { %1536 = vmatmul.mubr.msk.bf16.vlgmr.msra.gmra.mxu1 %vm427_vm1, %v1977_v9  ;;  %1540 = vmatpush3.bf16.msra.mxu0 %v1680_v15 }
  0x2c   : > { %1548 = vmatpush3.bf16.msra.mxu1 %v1681_v16  ;;  %1541 = vmatprep.subr.bf16.mxu0 %v1830_v1 }
  0x2d   : > { %1549 = vmatprep.subr.bf16.mxu1 %v1830_v1  ;;  %1543 = vmatprep.mubr.msk.bf16.mxu0 %vm1831_vm0, %v1830_v1 }
  0x2e   : > { %1551 = vmatprep.mubr.msk.bf16.mxu1 %vm1831_vm0, %v1830_v1 }
  0x2f   : > { %1542 = vmatpush3.bf16.msra.mxu0 %v1682_v17 }
  0x30   : > { %1550 = vmatpush3.bf16.msra.mxu1 %v1683_v18  ;;  %1555 = vmatprep.subr.bf16.mxu0 %v1830_v1 }
  0x31   : > { %1563 = vmatprep.subr.bf16.mxu1 %v1830_v1 }
  0x32   : > { %1544 = vmatmul.mubr.msk.bf16.vlgmr.msra.gmra.mxu0 %vm427_vm1, %v1979_v10 }
  0x33   : > { %1552 = vmatmul.mubr.msk.bf16.vlgmr.msra.gmra.mxu1 %vm427_vm1, %v2000_v14  ;;  %1556 = vmatpush3.bf16.msra.mxu0 %v1684_v19 }
  0x34   : > { %1564 = vmatpush3.bf16.msra.mxu1 %v1685_v20  ;;  %1557 = vmatprep.subr.bf16.mxu0 %v1830_v1 }
  0x35   : > { %1565 = vmatprep.subr.bf16.mxu1 %v1830_v1  ;;  %1559 = vmatprep.mubr.msk.bf16.mxu0 %vm1831_vm0, %v1830_v1 }
  0x36   : > { %1567 = vmatprep.mubr.msk.bf16.mxu1 %vm1831_vm0, %v1830_v1 }
  0x37   : > { %1558 = vmatpush3.bf16.msra.mxu0 %v1686_v21 }
  0x38   : > { %1566 = vmatpush3.bf16.msra.mxu1 %v1687_v22  ;;  %1571 = vmatprep.subr.bf16.mxu0 %v1830_v1 }
  0x39   : > { %1579 = vmatprep.subr.bf16.mxu1 %v1830_v1 }
  0x3a   : > { %1560 = vmatmul.mubr.msk.bf16.vlgmr.msra.gmra.mxu0 %vm427_vm1, %v1977_v9 }
  0x3b   : > { %1568 = vmatmul.mubr.msk.bf16.vlgmr.msra.gmra.mxu1 %vm427_vm1, %v1979_v10  ;;  %1572 = vmatpush3.bf16.msra.mxu0 %v1688_v23 }
  0x3c   : > { %1580 = vmatpush3.bf16.msra.mxu1 %v1689_v24  ;;  %1573 = vmatprep.subr.bf16.mxu0 %v1830_v1 }
  0x3d   : > { %1581 = vmatprep.subr.bf16.mxu1 %v1830_v1  ;;  %1575 = vmatprep.mubr.msk.bf16.mxu0 %vm1831_vm0, %v1830_v1 }
  0x3e   : > { %1583 = vmatprep.mubr.msk.bf16.mxu1 %vm1831_vm0, %v1830_v1 }
  0x3f   : > { %1574 = vmatpush3.bf16.msra.mxu0 %v1690_v25 }
  0x40   : > { %1582 = vmatpush3.bf16.msra.mxu1 %v1691_v26  ;;  %1587 = vmatprep.subr.bf16.mxu0 %v1830_v1 }
  0x41   : > { %1595 = vmatprep.subr.bf16.mxu1 %v1830_v1 }
  0x42   : > { %1576 = vmatmul.mubr.msk.bf16.vlgmr.msra.gmra.mxu0 %vm427_vm1, %v2000_v14 }
  0x43   : > { %1584 = vmatmul.mubr.msk.bf16.vlgmr.msra.gmra.mxu1 %vm427_vm1, %v1977_v9  ;;  %1588 = vmatpush3.bf16.msra.mxu0 %v1692_v27 }
  0x44   : > { %1596 = vmatpush3.bf16.msra.mxu1 %v1693_v28  ;;  %1589 = vmatprep.subr.bf16.mxu0 %v1830_v1 }
  0x45   : > { %1597 = vmatprep.subr.bf16.mxu1 %v1830_v1  ;;  %1591 = vmatprep.mubr.msk.bf16.mxu0 %vm1831_vm0, %v1830_v1 }
  0x46   : > { %1599 = vmatprep.mubr.msk.bf16.mxu1 %vm1831_vm0, %v1830_v1 }
  0x47   : > { %1590 = vmatpush3.bf16.msra.mxu0 %v1694_v29 }
  0x48   : > { %1598 = vmatpush3.bf16.msra.mxu1 %v1695_v30 }
  0x4a   : > { %1592 = vmatmul.mubr.msk.bf16.vlgmr.msra.gmra.mxu0 %vm427_vm1, %v1979_v10 }
  0x4b   : > { %1600 = vmatmul.mubr.msk.bf16.vlgmr.msra.gmra.mxu1 %vm427_vm1, %v2000_v14 }
  0xe2   : > { %v465_v31 = vpop.f32.mrf.mxu0 }
  0xe3   : > { %v527_v32 = vpop.f32.mrf.mxu1  ;;  %v471_v33 = vpack.c.bf16 %v465_v31, %v465_v31 }
  0xe4   : > { %v533_v34 = vpack.c.bf16 %v527_v32, %v527_v32  ;;  %v1513_v35 = vpop.f32.mrf.mxu0 }
  0xe5   : > { %v1521_v36 = vpop.f32.mrf.mxu1  ;;  %473 = vst.msk [vmem:[%s2105_s11] sm:$0xf] %vm472_vm2, %v471_v33 }
  0xe6   : > { %534 = vst.msk [vmem:[%s2109_s12] sm:$0xf] %vm472_vm2, %v533_v34  ;;  %v468_v37 = vpop.f32.mrf.mxu0 }
  0xe7   : > { %v530_v38 = vpop.f32.mrf.mxu1 }
  0xe8   : > { %v1514_v39 = vpop.f32.mrf.mxu0 }
  0xe9   : > { %v1522_v40 = vpop.f32.mrf.mxu1 }
  0xea   : > { %v588_v41 = vpop.f32.mrf.mxu0 }
  0xeb   : > { %v647_v42 = vpop.f32.mrf.mxu1  ;;  %v594_v43 = vpack.c.bf16 %v588_v41, %v588_v41 }
  0xec   : > { %v653_v44 = vpack.c.bf16 %v647_v42, %v647_v42  ;;  %v1529_v45 = vpop.f32.mrf.mxu0 }
  0xed   : > { %v1537_v46 = vpop.f32.mrf.mxu1  ;;  %595 = vst.msk [vmem:[%s2113_s16] sm:$0xf] %vm472_vm2, %v594_v43 }
  0xee   : > { %1392 = vst.msk [vmem:[%s2105_s11 + $0x4] sm:$0xf] %vm472_vm2, %v653_v44  ;;  %v591_v47 = vpop.f32.mrf.mxu0 }
  0xef   : > { %v650_v48 = vpop.f32.mrf.mxu1 }
  0xf0   : > { %v1530_v49 = vpop.f32.mrf.mxu0 }
  0xf1   : > { %v1538_v50 = vpop.f32.mrf.mxu1 }
  0xf2   : > { %v707_v51 = vpop.f32.mrf.mxu0 }
  0xf3   : > { %v767_v52 = vpop.f32.mrf.mxu1  ;;  %v713_v53 = vpack.c.bf16 %v707_v51, %v707_v51 }
  0xf4   : > { %v773_v54 = vpack.c.bf16 %v767_v52, %v767_v52  ;;  %v1545_v55 = vpop.f32.mrf.mxu0 }
  0xf5   : > { %v1553_v56 = vpop.f32.mrf.mxu1  ;;  %1400 = vst.msk [vmem:[%s2109_s12 + $0x4] sm:$0xf] %vm472_vm2, %v713_v53 }
  0xf6   : > { %1408 = vst.msk [vmem:[%s2113_s16 + $0x4] sm:$0xf] %vm472_vm2, %v773_v54  ;;  %v710_v57 = vpop.f32.mrf.mxu0 }
  0xf7   : > { %v770_v58 = vpop.f32.mrf.mxu1 }
  0xf8   : > { %v1546_v59 = vpop.f32.mrf.mxu0 }
  0xf9   : > { %v1554_v60 = vpop.f32.mrf.mxu1 }
  0xfa   : > { %v827_v61 = vpop.f32.mrf.mxu0 }
  0xfb   : > { %v887_v62 = vpop.f32.mrf.mxu1  ;;  %v833_v63 = vpack.c.bf16 %v827_v61, %v827_v61 }
  0xfc   : > { %v893_v0 = vpack.c.bf16 %v887_v62, %v887_v62  ;;  %v1561_v1 = vpop.f32.mrf.mxu0 }
  0xfd   : > { %v1569_v2 = vpop.f32.mrf.mxu1  ;;  %1416 = vst.msk [vmem:[%s2105_s11 + $0x8] sm:$0xf] %vm472_vm2, %v833_v63 }
  0xfe   : > { %1424 = vst.msk [vmem:[%s2109_s12 + $0x8] sm:$0xf] %vm472_vm2, %v893_v0  ;;  %v830_v3 = vpop.f32.mrf.mxu0 }
  0xff   : > { %v890_v4 = vpop.f32.mrf.mxu1 }
 0x100   : > { %v1562_v5 = vpop.f32.mrf.mxu0 }
 0x101   : > { %v1570_v6 = vpop.f32.mrf.mxu1 }
 0x102   : > { %v947_v7 = vpop.f32.mrf.mxu0 }
 0x103   : > { %v1007_v8 = vpop.f32.mrf.mxu1  ;;  %v953_v9 = vpack.c.bf16 %v947_v7, %v947_v7 }
 0x104   : > { %v1013_v10 = vpack.c.bf16 %v1007_v8, %v1007_v8  ;;  %v1577_v11 = vpop.f32.mrf.mxu0 }
 0x105   : > { %v1585_v12 = vpop.f32.mrf.mxu1  ;;  %1432 = vst.msk [vmem:[%s2113_s16 + $0x8] sm:$0xf] %vm472_vm2, %v953_v9 }
 0x106   : > { %1440 = vst.msk [vmem:[%s2105_s11 + $0xc] sm:$0xf] %vm472_vm2, %v1013_v10  ;;  %v950_v13 = vpop.f32.mrf.mxu0 }
 0x107   : > { %v1010_v14 = vpop.f32.mrf.mxu1 }
 0x108   : > { %1709 = shalt.err (!%p1706_p5)
}
 0x109   : > { %s1710_s21 = scalar_lea.hbm %s2137_s14, 256  ;;  %s1714_s20 = scalar_lea.hbm %s2278_s6, 512 }
 0x10a   : > { %p1711_p6 = scmp.ne.s32.totalorder %s2137_s14, %s1710_s21  ;;  %p1715_p10 = scmp.lt.s32.totalorder %s2137_s14, %s2278_s6 }
 0x10b   : > { %p1716_p11 = scmp.lt.s32.totalorder %s1714_s20, %s1710_s21 }
 0x10c   : > { %p1712_p7 = pnand %p1711_p6, %p1924_p4 }
 0x10d   : > { %p1717_p12 = por %p1716_p11, %p1715_p10 }
 0x10e   : > { %p1713_p9 = pneg %p1712_p7 }
 0x110   : > { %p1718_p13 = pnand %p1717_p12, %p1713_p9 }
 0x112   : > { %1721 = shalt.err (!%p1718_p13)
}
 0x113   : > { %s2283_s19 = smov 64   ;;  %s2285_s22 = smov 4   ;;  %v1578_v15 = vpop.f32.mrf.mxu0  ;;  %v1586_v16 = vpop.f32.mrf.mxu1 }
 0x114   : > { %1603 = dma.vmem_to_hbm [thread:$0]  (%p1924_p4), %s2131_s23, 256, %s2137_s14, %s2145_s30, %s2283_s19, %s2283_s19, %s2285_s22  }
 0x115   : > { %s1178_s0 = sshll.u32 %s2109_s12, 4  ;;  %s2293_s1 = sadd.s32 4294967295, %s1828_s10   ;;  %v1067_v17 = vpop.f32.mrf.mxu0  ;;  %v1127_v18 = vpop.f32.mrf.mxu1  ;;  %s2177_s0 = int_to_ptr.vmem [resolvable:$true] %s1178_s0 }
 0x116   : > { %s2174_s25 = sand.u32 1, %s2293_s1   ;;  %s1195_s21 = sshll.u32 %s2113_s16, 4  ;;  %v1073_v19 = vpack.c.bf16 %v1067_v17, %v1067_v17  ;;  %v1133_v20 = vpack.c.bf16 %v1127_v18, %v1127_v18  ;;  %s2185_s21 = int_to_ptr.vmem [resolvable:$true] %s1195_s21 }
 0x117   : > { %s2183_s30 = scalar_lea.hbm %s2279_s7, %s2129_s24  ;;  %v1593_v21 = vpop.f32.mrf.mxu0  ;;  %v1601_v22 = vpop.f32.mrf.mxu1  ;;  %s2191_s20 = scalar_lea.hbm %s2280_s8, %s2129_s24 }
 0x118   : > { %1448 = vst.msk [vmem:[%s2109_s12 + $0xc] sm:$0xf] %vm472_vm2, %v1073_v19  ;;  %1456 = vst.msk [vmem:[%s2113_s16 + $0xc] sm:$0xf] %vm472_vm2, %v1133_v20  ;;  %s1142_s1 = scalar_lea.sflag [#allocation5], %s2174_s25  ;;  %s1722_s23 = scalar_lea.vmem %s2177_s0, 256 }
 0x119   : > { %v1070_v23 = vpop.f32.mrf.mxu0  ;;  %v1130_v24 = vpop.f32.mrf.mxu1  ;;  %p1723_p0 = scmp.ne.s32.totalorder %s2177_s0, %s1722_s23  ;;  %s1835_s14 = smov [#allocation4]  }
 0x11a   : > { %s1726_s19 = sshll.u32 %s1835_s14, 4  ;;  %s1727_s19 = int_to_ptr.vmem [resolvable:$false] %s1726_s19 }
 0x11b   : > { %p1724_p1 = pnand %p1723_p0, %p1924_p4  ;;  %s1728_s22 = scalar_lea.vmem %s1727_s19, 512 }
 0x11c   : > { %p1729_p3 = scmp.lt.s32.totalorder %s2177_s0, %s1727_s19  ;;  %p1730_p5 = scmp.lt.s32.totalorder %s1728_s22, %s1722_s23 }
 0x11d   : > { %p1725_p2 = pneg %p1724_p1 }
 0x11e   : > { %p1731_p6 = por %p1730_p5, %p1729_p3 }
 0x120   : > { %p1732_p7 = pnand %p1731_p6, %p1725_p2 }
 0x122   : > { %1735 = shalt.err (!%p1732_p7)
}
 0x123   : > { %s1736_s12 = scalar_lea.hbm %s2183_s30, 256  ;;  %s1740_s11 = scalar_lea.hbm %s2279_s7, 512 }
 0x124   : > { %p1737_p9 = scmp.ne.s32.totalorder %s2183_s30, %s1736_s12  ;;  %p1741_p12 = scmp.lt.s32.totalorder %s2183_s30, %s2279_s7 }
 0x125   : > { %p1742_p13 = scmp.lt.s32.totalorder %s1740_s11, %s1736_s12 }
 0x126   : > { %p1738_p10 = pnand %p1737_p9, %p1924_p4 }
 0x127   : > { %p1743_p0 = por %p1742_p13, %p1741_p12 }
 0x128   : > { %p1739_p11 = pneg %p1738_p10 }
 0x12a   : > { %p1744_p1 = pnand %p1743_p0, %p1739_p11 }
 0x12c   : > { %1747 = shalt.err (!%p1744_p1)
}
 0x12d   : > { %s2294_s19 = smov 4   ;;  %s2295_s22 = smov 64  }
 0x12e   : > { %1604 = dma.vmem_to_hbm [thread:$0]  (%p1924_p4), %s2177_s0, 256, %s2183_s30, %s1142_s1, %s2295_s22, %s2295_s22, %s2294_s19  }
 0x12f   : > { %s1748_s23 = scalar_lea.vmem %s2185_s21, 256  ;;  %s1836_s12 = smov [#allocation6]  }
 0x130   : > { %p1749_p2 = scmp.ne.s32.totalorder %s2185_s21, %s1748_s23  ;;  %s1752_s16 = sshll.u32 %s1836_s12, 4  ;;  %s1753_s16 = int_to_ptr.vmem [resolvable:$false] %s1752_s16 }
 0x131   : > { %s1754_s24 = scalar_lea.vmem %s1753_s16, 512  ;;  %p1755_p6 = scmp.lt.s32.totalorder %s2185_s21, %s1753_s16 }
 0x132   : > { %p1750_p3 = pnand %p1749_p2, %p1924_p4  ;;  %p1756_p7 = scmp.lt.s32.totalorder %s1754_s24, %s1748_s23 }
 0x134   : > { %p1751_p5 = pneg %p1750_p3  ;;  %p1757_p9 = por %p1756_p7, %p1755_p6 }
 0x136   : > { %p1758_p10 = pnand %p1757_p9, %p1751_p5 }
 0x138   : > { %1761 = shalt.err (!%p1758_p10)
}
 0x139   : > { %s1762_s11 = scalar_lea.hbm %s2191_s20, 256  ;;  %s1766_s26 = scalar_lea.hbm %s2280_s8, 512 }
 0x13a   : > { %p1763_p11 = scmp.ne.s32.totalorder %s2191_s20, %s1762_s11  ;;  %p1767_p0 = scmp.lt.s32.totalorder %s2191_s20, %s2280_s8 }
 0x13b   : > { %p1768_p1 = scmp.lt.s32.totalorder %s1766_s26, %s1762_s11 }
 0x13c   : > { %p1764_p12 = pnand %p1763_p11, %p1924_p4 }
 0x13d   : > { %p1769_p2 = por %p1768_p1, %p1767_p0 }
 0x13e   : > { %p1765_p13 = pneg %p1764_p12 }
 0x140   : > { %p1770_p3 = pnand %p1769_p2, %p1765_p13 }
 0x142   : > { %1773 = shalt.err (!%p1770_p3)
}
 0x143   : > { %1605 = dma.vmem_to_hbm [thread:$0]  (%p1924_p4), %s2185_s21, 256, %s2191_s20, %s1142_s1, %s2295_s22, %s2295_s22, %s2294_s19   ;;  %v1594_v25 = vpop.f32.mrf.mxu0  ;;  %v1602_v26 = vpop.f32.mrf.mxu1 }
 0x144 PF: > { %p1619_p5 = scmp.ge.s32.totalorder %s1828_s10, 2  ;;  %s1210_s23 = sand.u32 1, %s1808_s27  }
 0x145   : > { %s1211_s15 = scalar_lea.sflag [#allocation3], %s1210_s23 }
 0x146   : > { %p1610_p6 = pnand %p1619_p5, %p1933_p8 }
 0x148   : > { %p1611_p7 = pneg %p1610_p6 }
 0x14a   : > { %1799 = dma.done.wait (%p1611_p7), %s1211_s15, 256  }
 0x14b   : > { %1801 = vsyncadd (%p1611_p7), %s1211_s15, 4294967040  ;;  %s2296_s16 = sadd.s32 4294967294, %s1828_s10  }
 0x14c   : > { %s1219_s25 = sand.u32 1, %s2296_s16  }
 0x14d   : > { %s1220_s24 = scalar_lea.sflag [#allocation5], %s1219_s25 }
 0x14e   : > { %1803 = dma.done.wait (%p1611_p7), %s1220_s24, 512  }
 0x14f   : > { %1805 = vsyncadd (%p1611_p7), %s1220_s24, 4294966784  ;;  %s25_s10 = sadd.s32 1, %s1828_s10   ;;  %s2297_s27 = smov %s1812_s28 }
 0x150   : > { %p22_p4 = scmp.ge.s32.totalorder %s25_s10, 4   ;;  %s2298_s28 = smov %s1816_s29 }
 0x151   : > { %s2299_s29 = smov %s1939_s18  ;;  %s2300_s30 = smov %s1824_s9 }
 0x152   : > { %s2301_s9 = smov %s2303_s13  ;;  %24 = sbr.rel (!%p22_p4) target bundleno = 9 (0x9), region = 135 }
 0x157   :  { %1234 = vsyncpa [#allocation3], 1 }
 0x158   :  { %1236 = vsyncpa [#allocation3 + $0x1], 1 }
 0x159   :  { %1237 = vsyncpa [#allocation5], 1 }
 0x15a   :  { %1239 = vsyncpa [#allocation5 + $0x1], 1 }

</bundles_post_ra>
